<compile_context>
chip_gen: v7x
topology: tpu7x:2x2x1
jax: 0.10.0
libtpu: 0.0.40
codegen_flags: <defaults>
</compile_context>

<pallas_src>
import jax
import jax.numpy as jnp
from jax import lax
from jax.experimental import pallas as pl
from jax.experimental.pallas import tpu as pltpu

IN_FEATURES = 768
OUT_FEATURES = 512


def linear_kernel(x_ref, w_ref, b_ref, o_ref):
    # x_ref: (tm, K) activations tile
    # w_ref: (N, K) full weight in PyTorch layout, resident in VMEM
    # b_ref: (1, N) bias, resident in VMEM
    # Single MXU push per grid step; contract on K (last dim of both operands).
    out = lax.dot_general(
        x_ref[...],
        w_ref[...],
        dimension_numbers=(((1,), (1,)), ((), ())),
        preferred_element_type=jnp.float32,
    )
    o_ref[...] = (out + b_ref[...]).astype(o_ref.dtype)


def pallas_linear(x2d, weight, bias, *, tm=256):
    """x2d: (M, 768) f32; weight: (512, 768) f32 (PyTorch layout); bias: (512,) f32."""
    M, K = x2d.shape
    N, Kw = weight.shape
    assert K == Kw and K == IN_FEATURES and N == OUT_FEATURES

    # For small M run the whole problem as one block (full-dim block is always
    # a legal block shape); otherwise tile M at 256 rows (divisible by 8,
    # lane-dense 512-wide output, ~5 MB double-buffered VMEM — fits all gens).
    tm = M if M <= tm else tm

    b2d = bias.reshape(1, N)
    grid = (pl.cdiv(M, tm),)

    return pl.pallas_call(
        linear_kernel,
        out_shape=jax.ShapeDtypeStruct((M, N), x2d.dtype),
        grid_spec=pltpu.PrefetchScalarGridSpec(
            num_scalar_prefetch=0,
            grid=grid,
            in_specs=[
                pl.BlockSpec((tm, K), lambda i: (i, 0)),   # x tile streams over M
                pl.BlockSpec((N, K), lambda i: (0, 0)),    # weight fetched once, resident
                pl.BlockSpec((1, N), lambda i: (0, 0)),    # bias resident
            ],
            out_specs=pl.BlockSpec((tm, N), lambda i: (i, 0)),
        ),
        compiler_params=pltpu.CompilerParams(
            dimension_semantics=("parallel",),
        ),
    )(x2d, weight, b2d)


@jax.jit
def interface_forward(x, weight, bias):
    """Equivalent of Interface.forward: nn.Linear(768, 512) on the last dim.

    x: (..., 768) -> (..., 512); weight: (512, 768); bias: (512,)
    """
    lead_shape = x.shape[:-1]
    x2d = x.reshape(-1, IN_FEATURES)
    out2d = pallas_linear(x2d, weight, bias)
    return out2d.reshape(*lead_shape, OUT_FEATURES)


if __name__ == "__main__":
    key = jax.random.PRNGKey(0)
    kx, kw, kb = jax.random.split(key, 3)

    # Small input consistent with the module: (batch=2, seq=8, hidden=768)
    x = jax.random.normal(kx, (2, 8, IN_FEATURES), dtype=jnp.float32)

    # Deterministic parameter init mimicking nn.Linear default:
    # U(-1/sqrt(fan_in), 1/sqrt(fan_in))
    bound = 1.0 / (IN_FEATURES ** 0.5)
    weight = jax.random.uniform(
        kw, (OUT_FEATURES, IN_FEATURES), minval=-bound, maxval=bound,
        dtype=jnp.float32,
    )
    bias = jax.random.uniform(
        kb, (OUT_FEATURES,), minval=-bound, maxval=bound, dtype=jnp.float32
    )

    out = interface_forward(x, weight, bias)
    out = jax.block_until_ready(out)

    # Correctness check against plain-JAX reference
    ref = x @ weight.T + bias
    assert out.shape == (2, 8, OUT_FEATURES)
    assert jnp.allclose(out, ref, atol=1e-4, rtol=1e-4)

    print("KERNEL_OK")
</pallas_src>

<mosaic_0001>
module attributes {stable_mosaic.version = 11 : i64} {
  func.func @linear_kernel(%arg0: i32, %arg1: memref<16x768xf32, #tpu.memory_space<vmem>>, %arg2: memref<512x768xf32, #tpu.memory_space<vmem>>, %arg3: memref<1x512xf32, #tpu.memory_space<vmem>>, %arg4: memref<16x512xf32, #tpu.memory_space<vmem>>) attributes {dimension_semantics = [#tpu.dimension_semantics<parallel>], iteration_bounds = array<i64: 1>, scalar_prefetch = 0 : i64, scratch_operands = 0 : i64, tpu.core_type = #tpu.core_type<tc>, window_params = [{transform_indices = @transform_0, window_bounds = array<i64: 16, 768>}, {pipeline_mode = #tpu.pipeline_mode<synchronous>, transform_indices = @transform_1, window_bounds = array<i64: 512, 768>}, {pipeline_mode = #tpu.pipeline_mode<synchronous>, transform_indices = @transform_2, window_bounds = array<i64: 1, 512>}, {transform_indices = @transform_3, window_bounds = array<i64: 16, 512>}]} {
    %c0 = arith.constant 0 : index
    %c0_0 = arith.constant 0 : index
    %0 = vector.load %arg1[%c0, %c0_0] : memref<16x768xf32, #tpu.memory_space<vmem>>, vector<16x768xf32>
    %c0_1 = arith.constant 0 : index
    %c0_2 = arith.constant 0 : index
    %1 = vector.load %arg2[%c0_1, %c0_2] : memref<512x768xf32, #tpu.memory_space<vmem>>, vector<512x768xf32>
    %cst = arith.constant dense<0.000000e+00> : vector<16x512xf32>
    %2 = tpu.matmul %0, %1, %cst {dimension_numbers = #tpu.dot_dimension_numbers<[1], [1], [0], [0], [0, 0, 1, 0], [], []>} : vector<16x768xf32>, vector<512x768xf32>, vector<16x512xf32> -> vector<16x512xf32>
    %c0_3 = arith.constant 0 : index
    %c0_4 = arith.constant 0 : index
    %3 = vector.load %arg3[%c0_3, %c0_4] : memref<1x512xf32, #tpu.memory_space<vmem>>, vector<1x512xf32>
    %4 = vector.broadcast %3 : vector<1x512xf32> to vector<16x512xf32>
    %5 = arith.addf %2, %4 : vector<16x512xf32>
    %c0_5 = arith.constant 0 : index
    %c0_6 = arith.constant 0 : index
    %6 = vector.load %arg4[%c0_5, %c0_6] : memref<16x512xf32, #tpu.memory_space<vmem>>, vector<16x512xf32>
    tpu.vector_store %arg4[%c0_5, %c0_6], %5 {strides = array<i32>} : memref<16x512xf32, #tpu.memory_space<vmem>>, vector<16x512xf32>,
    return
  }
  func.func @transform_0(%arg0: i32) -> (i32, i32) {
    %c0_i32 = arith.constant 0 : i32
    %c0_i32_0 = arith.constant 0 : i32
    return %arg0, %c0_i32 : i32, i32
  }
  func.func @transform_1(%arg0: i32) -> (i32, i32) {
    %c0_i32 = arith.constant 0 : i32
    %c0_i32_0 = arith.constant 0 : i32
    %c0_i32_1 = arith.constant 0 : i32
    return %c0_i32, %c0_i32_0 : i32, i32
  }
  func.func @transform_2(%arg0: i32) -> (i32, i32) {
    %c0_i32 = arith.constant 0 : i32
    %c0_i32_0 = arith.constant 0 : i32
    %c0_i32_1 = arith.constant 0 : i32
    return %c0_i32, %c0_i32_0 : i32, i32
  }
  func.func @transform_3(%arg0: i32) -> (i32, i32) {
    %c0_i32 = arith.constant 0 : i32
    %c0_i32_0 = arith.constant 0 : i32
    return %arg0, %c0_i32 : i32, i32
  }
}

</mosaic_0001>

<bundles_post_ra>
// kernel: interface_forward.1
= control target key start
LH: loop header
LB: loop body
LE: loop exit
PB: predicated region body
PF: predicated region fallthrough
CT: control target
= control target key end

     0   :  { %8 = vsyncpa [#allocation3], 0  ;;  %s1553_s0 = inlined_call_operand.hbm [shape: f32[16,768], index: 0, kind: input, shape index: {}]   ;;  %s1554_s1 = inlined_call_operand.hbm [shape: f32[512,768], index: 1, kind: input, shape index: {}]   ;;  %s1555_s2 = inlined_call_operand.hbm [shape: f32[1,512], index: 2, kind: input, shape index: {}]   ;;  %s1556_s3 = inlined_call_operand.hbm [shape: f32[16,512], index: 3, kind: output, shape index: {}]  }
   0x1   :  { %9 = vsyncpa [#allocation6], 0 }
   0x2   :  { %10 = vsyncpa [#allocation4], 0  ;;  %s1470_s12 = smov [#allocation5]   ;;  %s1471_s14 = smov [#allocation2]  }
   0x3   :  { %s28_s13 = sshll.u32 %s1470_s12, 4  ;;  %s16_s15 = sshll.u32 %s1471_s14, 4  ;;  %s29_s13 = int_to_ptr.vmem [resolvable:$true] %s28_s13  ;;  %s1498_s15 = int_to_ptr.vmem [resolvable:$true] %s16_s15 }
   0x4   :  { %s1376_s18 = scalar_lea.hbm %s1554_s1, 49152 }
   0x5   :  { %p1377_p0 = scmp.ne.s32.totalorder %s1554_s1, %s1376_s18  ;;  %p1380_p1 = scmp.lt.u32.totalorder %s1376_s18, %s1554_s1 }
   0x7   :  { %p1382_p2 = pnand %p1380_p1, %p1377_p0 }
   0x9   :  { %1385 = shalt.err (!%p1382_p2)
}
   0xa   :  { %s1386_s23 = scalar_lea.vmem %s29_s13, 49152  ;;  %p1391_p4 = scmp.lt.s32.totalorder %s29_s13, %s29_s13 }
   0xb   :  { %p1387_p3 = scmp.ne.s32.totalorder %s29_s13, %s1386_s23  ;;  %p1392_p5 = scmp.lt.s32.totalorder %s1386_s23, %s1386_s23 }
   0xd   :  { %p1393_p6 = por %p1392_p5, %p1391_p4 }
   0xf   :  { %p1394_p7 = pnand %p1393_p6, %p1387_p3 }
  0x11   :  { %1397 = shalt.err (!%p1394_p7)
}
  0x12   :  { %s1472_s24 = smov 768   ;;  %s1473_s25 = smov 48  }
  0x13   :  { %34 = dma.hbm_to_vmem [thread:$0]  %s1554_s1, 49152, %s29_s13, [#allocation6], %s1472_s24, %s1472_s24, %s1473_s25  }
  0x14   :  { %s1398_s30 = scalar_lea.hbm %s1553_s0, 1536 }
  0x15   :  { %p1399_p8 = scmp.ne.s32.totalorder %s1553_s0, %s1398_s30  ;;  %p1402_p9 = scmp.lt.u32.totalorder %s1398_s30, %s1553_s0 }
  0x17   :  { %p1404_p10 = pnand %p1402_p9, %p1399_p8 }
  0x19   :  { %1407 = shalt.err (!%p1404_p10)
}
  0x1a   :  { %s1408_s8 = scalar_lea.vmem %s1498_s15, 1536  ;;  %p1413_p12 = scmp.lt.s32.totalorder %s1498_s15, %s1498_s15 }
  0x1b   :  { %p1409_p11 = scmp.ne.s32.totalorder %s1498_s15, %s1408_s8  ;;  %p1414_p13 = scmp.lt.s32.totalorder %s1408_s8, %s1408_s8 }
  0x1d   :  { %p1415_p0 = por %p1414_p13, %p1413_p12 }
  0x1f   :  { %p1416_p1 = pnand %p1415_p0, %p1409_p11 }
  0x21   :  { %1419 = shalt.err (!%p1416_p1)
}
  0x22   :  { %22 = dma.hbm_to_vmem [thread:$0]  %s1553_s0, 1536, %s1498_s15, [#allocation3], %s1472_s24, %s1472_s24, %s1473_s25  }
  0x23   :  { %s1474_s10 = smov [#allocation7]   ;;  %s1420_s14 = scalar_lea.hbm %s1555_s2, 64 }
  0x24   :  { %s41_s11 = sshll.u32 %s1474_s10, 4  ;;  %p1421_p2 = scmp.ne.s32.totalorder %s1555_s2, %s1420_s14  ;;  %s42_s11 = int_to_ptr.vmem [resolvable:$true] %s41_s11 }
  0x25   :  { %p1424_p3 = scmp.lt.u32.totalorder %s1420_s14, %s1555_s2 }
  0x27   :  { %p1426_p4 = pnand %p1424_p3, %p1421_p2 }
  0x29   :  { %1429 = shalt.err (!%p1426_p4)
}
  0x2a   :  { %s1430_s20 = scalar_lea.vmem %s42_s11, 64  ;;  %p1435_p6 = scmp.lt.s32.totalorder %s42_s11, %s42_s11 }
  0x2b   :  { %p1431_p5 = scmp.ne.s32.totalorder %s42_s11, %s1430_s20  ;;  %p1436_p7 = scmp.lt.s32.totalorder %s1430_s20, %s1430_s20 }
  0x2d   :  { %p1437_p8 = por %p1436_p7, %p1435_p6 }
  0x2f   :  { %p1438_p9 = pnand %p1437_p8, %p1431_p5 }
  0x31   :  { %1441 = shalt.err (!%p1438_p9)
}
  0x32   :  { %44 = dma.hbm_to_vmem [thread:$0]  %s1555_s2, 64, %s42_s11, [#allocation6]  }
  0x33   :  { %1464 = dma.done.wait [#allocation3], 1536  }
  0x34   :  { %1465 = vsyncadd [#allocation3], 4294965760 }
  0x35   :  { %1466 = dma.done.wait [#allocation6], 49216  }
  0x36   :  { %1467 = vsyncadd [#allocation6], 4294918080  ;;  %v67_v0 = vld [vmem:[#allocation5 + $0x8] sm:$0xff]  ;;  %v73_v1 = vld [vmem:[#allocation5 + $0x38] sm:$0xff]  ;;  %s1475_s2 = smov [#allocation8]  }
  0x37   :  { %v259_v2 = vld [vmem:[#allocation5 + $0x608] sm:$0xff]  ;;  %v960_v3 = vpack.c.bf16 %v73_v1, %v67_v0  ;;  %v265_v4 = vld [vmem:[#allocation5 + $0x638] sm:$0xff]  ;;  %v66_v5 = vld [vmem:[#allocation5] sm:$0xff]  ;;  %s947_s21 = sshll.u32 %s1475_s2, 4  ;;  %s948_s21 = int_to_ptr.vmem [resolvable:$true] %s947_s21 }
  0x38   :  { %v72_v6 = vld [vmem:[#allocation5 + $0x30] sm:$0xff]  ;;  %v1152_v7 = vpack.c.bf16 %v265_v4, %v259_v2  ;;  %v258_v9 = vld [vmem:[#allocation5 + $0x600] sm:$0xff]  ;;  %v79_v11 = vld [vmem:[#allocation5 + $0x68] sm:$0xff]  ;;  %s1442_s22 = scalar_lea.vmem %s948_s21, 1024  ;;  %p1447_p11 = scmp.lt.s32.totalorder %s948_s21, %s948_s21 }
  0x39   :  { %v962_v8 = vpack.c.bf16 %v72_v6, %v66_v5  ;;  %v264_v10 = vld [vmem:[#allocation5 + $0x630] sm:$0xff]  ;;  %961 = vmatprep.subr.bf16.mxu0 %v960_v3  ;;  %v85_v13 = vld [vmem:[#allocation5 + $0x98] sm:$0xff]  ;;  %v271_v14 = vld [vmem:[#allocation5 + $0x668] sm:$0xff]  ;;  %p1443_p10 = scmp.ne.s32.totalorder %s948_s21, %s1442_s22  ;;  %p1448_p12 = scmp.lt.s32.totalorder %s1442_s22, %s1442_s22 }
  0x3a   :  { %v1154_v12 = vpack.c.bf16 %v264_v10, %v258_v9  ;;  %v277_v15 = vld [vmem:[#allocation5 + $0x698] sm:$0xff]  ;;  %1153 = vmatprep.subr.bf16.mxu1 %v1152_v7  ;;  %v964_v16 = vpack.c.bf16 %v85_v13, %v79_v11  ;;  %v78_v18 = vld [vmem:[#allocation5 + $0x60] sm:$0xff]  ;;  %v84_v19 = vld [vmem:[#allocation5 + $0x90] sm:$0xff] }
  0x3b   :  { %963 = vmatpush1.bf16.xpose.msra.mxu0 %v962_v8  ;;  %v1156_v17 = vpack.c.bf16 %v277_v15, %v271_v14  ;;  %v270_v20 = vld [vmem:[#allocation5 + $0x660] sm:$0xff]  ;;  %v276_v21 = vld [vmem:[#allocation5 + $0x690] sm:$0xff]  ;;  %v91_v22 = vld [vmem:[#allocation5 + $0xc8] sm:$0xff]  ;;  %v966_v26 = vpack.c.bf16 %v84_v19, %v78_v18  ;;  %p1449_p13 = por %p1448_p12, %p1447_p11 }
  0x3c   :  { %1155 = vmatpush1.bf16.xpose.msra.mxu1 %v1154_v12  ;;  %965 = vmatprep.subr.bf16.mxu0 %v964_v16  ;;  %v97_v23 = vld [vmem:[#allocation5 + $0xf8] sm:$0xff]  ;;  %v283_v24 = vld [vmem:[#allocation5 + $0x6c8] sm:$0xff]  ;;  %v1158_v27 = vpack.c.bf16 %v276_v21, %v270_v20  ;;  %v90_v30 = vld [vmem:[#allocation5 + $0xc0] sm:$0xff] }
  0x3d   :  { %1157 = vmatprep.subr.bf16.mxu1 %v1156_v17  ;;  %v289_v25 = vld [vmem:[#allocation5 + $0x6f8] sm:$0xff]  ;;  %v968_v28 = vpack.c.bf16 %v97_v23, %v91_v22  ;;  %v96_v31 = vld [vmem:[#allocation5 + $0xf0] sm:$0xff]  ;;  %v282_v32 = vld [vmem:[#allocation5 + $0x6c0] sm:$0xff]  ;;  %p1450_p0 = pnand %p1449_p13, %p1443_p10 }
  0x3e   :  { %v1160_v29 = vpack.c.bf16 %v289_v25, %v283_v24  ;;  %v288_v33 = vld [vmem:[#allocation5 + $0x6f0] sm:$0xff]  ;;  %v103_v34 = vld [vmem:[#allocation5 + $0x128] sm:$0xff]  ;;  %v109_v35 = vld [vmem:[#allocation5 + $0x158] sm:$0xff]  ;;  %v970_v38 = vpack.c.bf16 %v96_v31, %v90_v30 }
  0x3f   :  { %v295_v36 = vld [vmem:[#allocation5 + $0x728] sm:$0xff]  ;;  %v301_v37 = vld [vmem:[#allocation5 + $0x758] sm:$0xff]  ;;  %v1162_v39 = vpack.c.bf16 %v288_v33, %v282_v32  ;;  %v972_v40 = vpack.c.bf16 %v109_v35, %v103_v34  ;;  %v102_v42 = vld [vmem:[#allocation5 + $0x120] sm:$0xff] }
  0x40   :  { %v1164_v41 = vpack.c.bf16 %v301_v37, %v295_v36  ;;  %v108_v43 = vld [vmem:[#allocation5 + $0x150] sm:$0xff]  ;;  %v294_v44 = vld [vmem:[#allocation5 + $0x720] sm:$0xff]  ;;  %v115_v46 = vld [vmem:[#allocation5 + $0x188] sm:$0xff] }
  0x41   :  { %v300_v45 = vld [vmem:[#allocation5 + $0x750] sm:$0xff]  ;;  %v121_v47 = vld [vmem:[#allocation5 + $0x1b8] sm:$0xff]  ;;  %v307_v48 = vld [vmem:[#allocation5 + $0x788] sm:$0xff]  ;;  %v974_v50 = vpack.c.bf16 %v108_v43, %v102_v42 }
  0x42   :  { %v313_v49 = vld [vmem:[#allocation5 + $0x7b8] sm:$0xff]  ;;  %v1166_v51 = vpack.c.bf16 %v300_v45, %v294_v44  ;;  %v976_v52 = vpack.c.bf16 %v121_v47, %v115_v46  ;;  %v114_v54 = vld [vmem:[#allocation5 + $0x180] sm:$0xff]  ;;  %v120_v55 = vld [vmem:[#allocation5 + $0x1b0] sm:$0xff] }
  0x43   :  { %967 = vmatpush1.bf16.xpose.msra.mxu0 %v966_v26  ;;  %v1168_v53 = vpack.c.bf16 %v313_v49, %v307_v48  ;;  %v306_v56 = vld [vmem:[#allocation5 + $0x780] sm:$0xff]  ;;  %v312_v57 = vld [vmem:[#allocation5 + $0x7b0] sm:$0xff]  ;;  %v127_v58 = vld [vmem:[#allocation5 + $0x1e8] sm:$0xff]  ;;  %v978_v62 = vpack.c.bf16 %v120_v55, %v114_v54 }
  0x44   :  { %1159 = vmatpush1.bf16.xpose.msra.mxu1 %v1158_v27  ;;  %969 = vmatprep.subr.bf16.mxu0 %v968_v28  ;;  %v133_v59 = vld [vmem:[#allocation5 + $0x218] sm:$0xff]  ;;  %v319_v60 = vld [vmem:[#allocation5 + $0x7e8] sm:$0xff]  ;;  %v1170_v63 = vpack.c.bf16 %v312_v57, %v306_v56  ;;  %v126_v2 = vld [vmem:[#allocation5 + $0x1e0] sm:$0xff] }
  0x45   :  { %1161 = vmatprep.subr.bf16.mxu1 %v1160_v29  ;;  %v325_v61 = vld [vmem:[#allocation5 + $0x818] sm:$0xff]  ;;  %v980_v0 = vpack.c.bf16 %v133_v59, %v127_v58  ;;  %v132_v3 = vld [vmem:[#allocation5 + $0x210] sm:$0xff]  ;;  %v318_v4 = vld [vmem:[#allocation5 + $0x7e0] sm:$0xff] }
  0x46   :  { %v1172_v1 = vpack.c.bf16 %v325_v61, %v319_v60  ;;  %v324_v5 = vld [vmem:[#allocation5 + $0x810] sm:$0xff]  ;;  %v139_v6 = vld [vmem:[#allocation5 + $0x248] sm:$0xff]  ;;  %v145_v7 = vld [vmem:[#allocation5 + $0x278] sm:$0xff]  ;;  %v982_v10 = vpack.c.bf16 %v132_v3, %v126_v2 }
  0x47   :  { %v331_v8 = vld [vmem:[#allocation5 + $0x848] sm:$0xff]  ;;  %v337_v9 = vld [vmem:[#allocation5 + $0x878] sm:$0xff]  ;;  %v1174_v11 = vpack.c.bf16 %v324_v5, %v318_v4  ;;  %v984_v12 = vpack.c.bf16 %v145_v7, %v139_v6  ;;  %v138_v15 = vld [vmem:[#allocation5 + $0x240] sm:$0xff] }
  0x48   :  { %v1176_v13 = vpack.c.bf16 %v337_v9, %v331_v8  ;;  %v55_v14 = vld [vmem:[#allocation2 + $0x8] sm:$0xff]  ;;  %v144_v16 = vld [vmem:[#allocation5 + $0x270] sm:$0xff]  ;;  %v330_v17 = vld [vmem:[#allocation5 + $0x840] sm:$0xff] }
  0x49   :  { %536 = vmatprep.mubr.f32.mxu0 %v55_v14  ;;  %767 = vmatprep.mubr.f32.mxu1 %v55_v14  ;;  %v336_v18 = vld [vmem:[#allocation5 + $0x870] sm:$0xff]  ;;  %v151_v19 = vld [vmem:[#allocation5 + $0x2a8] sm:$0xff]  ;;  %v157_v20 = vld [vmem:[#allocation5 + $0x2d8] sm:$0xff]  ;;  %v986_v23 = vpack.c.bf16 %v144_v16, %v138_v15 }
  0x4a   :  { %v343_v21 = vld [vmem:[#allocation5 + $0x8a8] sm:$0xff]  ;;  %v349_v22 = vld [vmem:[#allocation5 + $0x8d8] sm:$0xff]  ;;  %v1178_v24 = vpack.c.bf16 %v336_v18, %v330_v17  ;;  %v988_v25 = vpack.c.bf16 %v157_v20, %v151_v19  ;;  %v150_v27 = vld [vmem:[#allocation5 + $0x2a0] sm:$0xff] }
  0x4b   :  { %971 = vmatpush1.bf16.xpose.msra.mxu0 %v970_v38  ;;  %v1180_v26 = vpack.c.bf16 %v349_v22, %v343_v21  ;;  %v156_v28 = vld [vmem:[#allocation5 + $0x2d0] sm:$0xff]  ;;  %v342_v29 = vld [vmem:[#allocation5 + $0x8a0] sm:$0xff]  ;;  %v163_v31 = vld [vmem:[#allocation5 + $0x308] sm:$0xff] }
  0x4c   :  { %1163 = vmatpush1.bf16.xpose.msra.mxu1 %v1162_v39  ;;  %973 = vmatprep.subr.bf16.mxu0 %v972_v40  ;;  %v348_v30 = vld [vmem:[#allocation5 + $0x8d0] sm:$0xff]  ;;  %v169_v32 = vld [vmem:[#allocation5 + $0x338] sm:$0xff]  ;;  %v355_v33 = vld [vmem:[#allocation5 + $0x908] sm:$0xff]  ;;  %v990_v35 = vpack.c.bf16 %v156_v28, %v150_v27 }
  0x4d   :  { %1165 = vmatprep.subr.bf16.mxu1 %v1164_v41  ;;  %v361_v34 = vld [vmem:[#allocation5 + $0x938] sm:$0xff]  ;;  %v1182_v36 = vpack.c.bf16 %v348_v30, %v342_v29  ;;  %v992_v37 = vpack.c.bf16 %v169_v32, %v163_v31  ;;  %v162_v39 = vld [vmem:[#allocation5 + $0x300] sm:$0xff]  ;;  %v168_v40 = vld [vmem:[#allocation5 + $0x330] sm:$0xff] }
  0x4e   :  { %v1184_v38 = vpack.c.bf16 %v361_v34, %v355_v33  ;;  %v354_v41 = vld [vmem:[#allocation5 + $0x900] sm:$0xff]  ;;  %v360_v42 = vld [vmem:[#allocation5 + $0x930] sm:$0xff]  ;;  %v175_v43 = vld [vmem:[#allocation5 + $0x368] sm:$0xff]  ;;  %v994_v47 = vpack.c.bf16 %v168_v40, %v162_v39 }
  0x4f   :  { %v181_v44 = vld [vmem:[#allocation5 + $0x398] sm:$0xff]  ;;  %v367_v45 = vld [vmem:[#allocation5 + $0x968] sm:$0xff]  ;;  %v1186_v48 = vpack.c.bf16 %v360_v42, %v354_v41  ;;  %v372_v54 = vld [vmem:[#allocation5 + $0x990] sm:$0xff] }
  0x50   :  { %v373_v46 = vld [vmem:[#allocation5 + $0x998] sm:$0xff]  ;;  %v996_v49 = vpack.c.bf16 %v181_v44, %v175_v43  ;;  %v187_v55 = vld [vmem:[#allocation5 + $0x3c8] sm:$0xff]  ;;  %v384_v2 = vld [vmem:[#allocation5 + $0x9f0] sm:$0xff] }
  0x51   :  { %v193_v56 = vld [vmem:[#allocation5 + $0x3f8] sm:$0xff]  ;;  %v379_v57 = vld [vmem:[#allocation5 + $0x9c8] sm:$0xff]  ;;  %v396_v14 = vld [vmem:[#allocation5 + $0xa50] sm:$0xff] }
  0x52   :  { %v385_v58 = vld [vmem:[#allocation5 + $0x9f8] sm:$0xff]  ;;  %v1000_v61 = vpack.c.bf16 %v193_v56, %v187_v55  ;;  %v199_v3 = vld [vmem:[#allocation5 + $0x428] sm:$0xff] }
  0x53   :  { %975 = vmatpush1.bf16.xpose.msra.mxu0 %v974_v50  ;;  %v1188_v50 = vpack.c.bf16 %v373_v46, %v367_v45  ;;  %v205_v4 = vld [vmem:[#allocation5 + $0x458] sm:$0xff]  ;;  %v391_v5 = vld [vmem:[#allocation5 + $0xa28] sm:$0xff] }
  0x54   :  { %1167 = vmatpush1.bf16.xpose.msra.mxu1 %v1166_v51  ;;  %977 = vmatprep.subr.bf16.mxu0 %v976_v52  ;;  %v174_v51 = vld [vmem:[#allocation5 + $0x360] sm:$0xff]  ;;  %v180_v52 = vld [vmem:[#allocation5 + $0x390] sm:$0xff]  ;;  %v397_v6 = vld [vmem:[#allocation5 + $0xa58] sm:$0xff]  ;;  %v1004_v9 = vpack.c.bf16 %v205_v4, %v199_v3 }
  0x55   :  { %1169 = vmatprep.subr.bf16.mxu1 %v1168_v53  ;;  %v366_v53 = vld [vmem:[#allocation5 + $0x960] sm:$0xff]  ;;  %v998_v59 = vpack.c.bf16 %v180_v52, %v174_v51  ;;  %v211_v15 = vld [vmem:[#allocation5 + $0x488] sm:$0xff]  ;;  %v217_v16 = vld [vmem:[#allocation5 + $0x4b8] sm:$0xff] }
  0x56   :  { %v1190_v60 = vpack.c.bf16 %v372_v54, %v366_v53  ;;  %v403_v17 = vld [vmem:[#allocation5 + $0xa88] sm:$0xff]  ;;  %v409_v18 = vld [vmem:[#allocation5 + $0xab8] sm:$0xff]  ;;  %v1008_v21 = vpack.c.bf16 %v217_v16, %v211_v15  ;;  %v54_v15 = vld [vmem:[#allocation2] sm:$0xff] }
  0x57   :  { %v1200_v22 = vpack.c.bf16 %v409_v18, %v403_v17  ;;  %v223_v27 = vld [vmem:[#allocation5 + $0x4e8] sm:$0xff]  ;;  %v229_v28 = vld [vmem:[#allocation5 + $0x518] sm:$0xff] }
  0x58   :  { %v415_v29 = vld [vmem:[#allocation5 + $0xae8] sm:$0xff]  ;;  %v421_v30 = vld [vmem:[#allocation5 + $0xb18] sm:$0xff]  ;;  %v1012_v33 = vpack.c.bf16 %v229_v28, %v223_v27 }
  0x59   :  { %v1204_v34 = vpack.c.bf16 %v421_v30, %v415_v29  ;;  %v235_v39 = vld [vmem:[#allocation5 + $0x548] sm:$0xff]  ;;  %v241_v40 = vld [vmem:[#allocation5 + $0x578] sm:$0xff] }
  0x5a   :  { %v427_v41 = vld [vmem:[#allocation5 + $0xb48] sm:$0xff]  ;;  %v433_v42 = vld [vmem:[#allocation5 + $0xb78] sm:$0xff]  ;;  %v1016_v45 = vpack.c.bf16 %v241_v40, %v235_v39 }
  0x5b   :  { %979 = vmatpush1.bf16.xpose.msra.mxu0 %v978_v62  ;;  %v1192_v62 = vpack.c.bf16 %v385_v58, %v379_v57  ;;  %v1208_v46 = vpack.c.bf16 %v433_v42, %v427_v41  ;;  %v247_v51 = vld [vmem:[#allocation5 + $0x5a8] sm:$0xff]  ;;  %v253_v52 = vld [vmem:[#allocation5 + $0x5d8] sm:$0xff] }
  0x5c   :  { %1171 = vmatpush1.bf16.xpose.msra.mxu1 %v1170_v63  ;;  %981 = vmatprep.subr.bf16.mxu0 %v980_v0  ;;  %v186_v63 = vld [vmem:[#allocation5 + $0x3c0] sm:$0xff]  ;;  %v192_v0 = vld [vmem:[#allocation5 + $0x3f0] sm:$0xff]  ;;  %v439_v53 = vld [vmem:[#allocation5 + $0xba8] sm:$0xff]  ;;  %v1020_v57 = vpack.c.bf16 %v253_v52, %v247_v51 }
  0x5d   :  { %1173 = vmatprep.subr.bf16.mxu1 %v1172_v1  ;;  %v378_v1 = vld [vmem:[#allocation5 + $0x9c0] sm:$0xff]  ;;  %v1002_v7 = vpack.c.bf16 %v192_v0, %v186_v63  ;;  %v445_v54 = vld [vmem:[#allocation5 + $0xbd8] sm:$0xff]  ;;  %v75_v0 = vld [vmem:[#allocation5 + $0x48] sm:$0xff] }
  0x5e   :  { %v1194_v8 = vpack.c.bf16 %v384_v2, %v378_v1  ;;  %v1212_v58 = vpack.c.bf16 %v445_v54, %v439_v53  ;;  %v69_v63 = vld [vmem:[#allocation5 + $0x18] sm:$0xff]  ;;  %v267_v2 = vld [vmem:[#allocation5 + $0x648] sm:$0xff] }
  0x5f   :  { %v261_v1 = vld [vmem:[#allocation5 + $0x618] sm:$0xff]  ;;  %v99_v28 = vld [vmem:[#allocation5 + $0x108] sm:$0xff] }
  0x60   :  { %v93_v27 = vld [vmem:[#allocation5 + $0xd8] sm:$0xff]  ;;  %v291_v30 = vld [vmem:[#allocation5 + $0x708] sm:$0xff] }
  0x61   :  { %v285_v29 = vld [vmem:[#allocation5 + $0x6d8] sm:$0xff]  ;;  %v111_v40 = vld [vmem:[#allocation5 + $0x168] sm:$0xff] }
  0x62   :  { %v105_v39 = vld [vmem:[#allocation5 + $0x138] sm:$0xff]  ;;  %v303_v42 = vld [vmem:[#allocation5 + $0x768] sm:$0xff] }
  0x63   :  { %983 = vmatpush1.bf16.xpose.msra.mxu0 %v982_v10  ;;  %v1196_v10 = vpack.c.bf16 %v397_v6, %v391_v5  ;;  %v1024_v5 = vpack.c.bf16 %v75_v0, %v69_v63  ;;  %v1216_v6 = vpack.c.bf16 %v267_v2, %v261_v1  ;;  %v297_v41 = vld [vmem:[#allocation5 + $0x738] sm:$0xff]  ;;  %v123_v52 = vld [vmem:[#allocation5 + $0x1c8] sm:$0xff] }
  0x64   :  { %1175 = vmatpush1.bf16.xpose.msra.mxu1 %v1174_v11  ;;  %985 = vmatprep.subr.bf16.mxu0 %v984_v12  ;;  %v198_v11 = vld [vmem:[#allocation5 + $0x420] sm:$0xff]  ;;  %v204_v12 = vld [vmem:[#allocation5 + $0x450] sm:$0xff]  ;;  %v117_v51 = vld [vmem:[#allocation5 + $0x198] sm:$0xff] }
  0x65   :  { %1177 = vmatprep.subr.bf16.mxu1 %v1176_v13  ;;  %v390_v13 = vld [vmem:[#allocation5 + $0xa20] sm:$0xff]  ;;  %v1006_v19 = vpack.c.bf16 %v204_v12, %v198_v11  ;;  %v81_v11 = vld [vmem:[#allocation5 + $0x78] sm:$0xff]  ;;  %v87_v12 = vld [vmem:[#allocation5 + $0xa8] sm:$0xff] }
  0x66   :  { %v1198_v20 = vpack.c.bf16 %v396_v14, %v390_v13  ;;  %v273_v13 = vld [vmem:[#allocation5 + $0x678] sm:$0xff]  ;;  %v279_v14 = vld [vmem:[#allocation5 + $0x6a8] sm:$0xff]  ;;  %v1028_v18 = vpack.c.bf16 %v87_v12, %v81_v11 }
  0x67   :  { %v309_v53 = vld [vmem:[#allocation5 + $0x798] sm:$0xff]  ;;  %v315_v54 = vld [vmem:[#allocation5 + $0x7c8] sm:$0xff] }
  0x68   :  { %v129_v63 = vld [vmem:[#allocation5 + $0x1f8] sm:$0xff]  ;;  %v135_v0 = vld [vmem:[#allocation5 + $0x228] sm:$0xff] }
  0x69   :  { %v321_v1 = vld [vmem:[#allocation5 + $0x7f8] sm:$0xff]  ;;  %v327_v2 = vld [vmem:[#allocation5 + $0x828] sm:$0xff] }
  0x6a   :  { %v141_v11 = vld [vmem:[#allocation5 + $0x258] sm:$0xff]  ;;  %v147_v12 = vld [vmem:[#allocation5 + $0x288] sm:$0xff] }
  0x6b   :  { %987 = vmatpush1.bf16.xpose.msra.mxu0 %v986_v23  ;;  %v210_v23 = vld [vmem:[#allocation5 + $0x480] sm:$0xff] }
  0x6c   :  { %1179 = vmatpush1.bf16.xpose.msra.mxu1 %v1178_v24  ;;  %989 = vmatprep.subr.bf16.mxu0 %v988_v25  ;;  %v216_v24 = vld [vmem:[#allocation5 + $0x4b0] sm:$0xff]  ;;  %v402_v25 = vld [vmem:[#allocation5 + $0xa80] sm:$0xff] }
  0x6d   :  { %1181 = vmatprep.subr.bf16.mxu1 %v1180_v26  ;;  %v408_v26 = vld [vmem:[#allocation5 + $0xab0] sm:$0xff]  ;;  %v1010_v31 = vpack.c.bf16 %v216_v24, %v210_v23  ;;  %v86_v23 = vld [vmem:[#allocation5 + $0xa0] sm:$0xff] }
  0x6e   :  { %v1202_v32 = vpack.c.bf16 %v408_v26, %v402_v25  ;;  %v272_v24 = vld [vmem:[#allocation5 + $0x670] sm:$0xff]  ;;  %v57_v25 = vld [vmem:[#allocation2 + $0x18] sm:$0xff]  ;;  %v278_v26 = vld [vmem:[#allocation5 + $0x6a0] sm:$0xff] }
  0x73   :  { %991 = vmatpush1.bf16.xpose.msra.mxu0 %v990_v35  ;;  %v222_v35 = vld [vmem:[#allocation5 + $0x4e0] sm:$0xff] }
  0x74   :  { %1183 = vmatpush1.bf16.xpose.msra.mxu1 %v1182_v36  ;;  %993 = vmatprep.subr.bf16.mxu0 %v992_v37  ;;  %v228_v36 = vld [vmem:[#allocation5 + $0x510] sm:$0xff]  ;;  %v414_v37 = vld [vmem:[#allocation5 + $0xae0] sm:$0xff] }
  0x75   :  { %1185 = vmatprep.subr.bf16.mxu1 %v1184_v38  ;;  %v420_v38 = vld [vmem:[#allocation5 + $0xb10] sm:$0xff]  ;;  %v1014_v43 = vpack.c.bf16 %v228_v36, %v222_v35  ;;  %v98_v36 = vld [vmem:[#allocation5 + $0x100] sm:$0xff] }
  0x76   :  { %v1206_v44 = vpack.c.bf16 %v420_v38, %v414_v37  ;;  %v92_v35 = vld [vmem:[#allocation5 + $0xd0] sm:$0xff]  ;;  %v290_v38 = vld [vmem:[#allocation5 + $0x700] sm:$0xff] }
  0x77   :  { %v284_v37 = vld [vmem:[#allocation5 + $0x6d0] sm:$0xff] }
  0x7b   :  { %995 = vmatpush1.bf16.xpose.msra.mxu0 %v994_v47  ;;  %v234_v47 = vld [vmem:[#allocation5 + $0x540] sm:$0xff] }
  0x7c   :  { %1187 = vmatpush1.bf16.xpose.msra.mxu1 %v1186_v48  ;;  %997 = vmatprep.subr.bf16.mxu0 %v996_v49  ;;  %v240_v48 = vld [vmem:[#allocation5 + $0x570] sm:$0xff]  ;;  %v426_v49 = vld [vmem:[#allocation5 + $0xb40] sm:$0xff] }
  0x7d   :  { %1189 = vmatprep.subr.bf16.mxu1 %v1188_v50  ;;  %v432_v50 = vld [vmem:[#allocation5 + $0xb70] sm:$0xff]  ;;  %v1018_v55 = vpack.c.bf16 %v240_v48, %v234_v47  ;;  %v110_v48 = vld [vmem:[#allocation5 + $0x160] sm:$0xff] }
  0x7e   :  { %v1210_v56 = vpack.c.bf16 %v432_v50, %v426_v49  ;;  %v104_v47 = vld [vmem:[#allocation5 + $0x130] sm:$0xff]  ;;  %v302_v50 = vld [vmem:[#allocation5 + $0x760] sm:$0xff] }
  0x7f   :  { %v296_v49 = vld [vmem:[#allocation5 + $0x730] sm:$0xff] }
  0x83   :  { %999 = vmatpush1.bf16.xpose.msra.mxu0 %v998_v59  ;;  %v246_v59 = vld [vmem:[#allocation5 + $0x5a0] sm:$0xff] }
  0x84   :  { %1191 = vmatpush1.bf16.xpose.msra.mxu1 %v1190_v60  ;;  %1001 = vmatprep.subr.bf16.mxu0 %v1000_v61  ;;  %v252_v60 = vld [vmem:[#allocation5 + $0x5d0] sm:$0xff]  ;;  %v438_v61 = vld [vmem:[#allocation5 + $0xba0] sm:$0xff] }
  0x85   :  { %1193 = vmatprep.subr.bf16.mxu1 %v1192_v62  ;;  %v444_v62 = vld [vmem:[#allocation5 + $0xbd0] sm:$0xff]  ;;  %v1022_v3 = vpack.c.bf16 %v252_v60, %v246_v59  ;;  %v122_v60 = vld [vmem:[#allocation5 + $0x1c0] sm:$0xff] }
  0x86   :  { %v1214_v4 = vpack.c.bf16 %v444_v62, %v438_v61  ;;  %v116_v59 = vld [vmem:[#allocation5 + $0x190] sm:$0xff]  ;;  %v314_v62 = vld [vmem:[#allocation5 + $0x7c0] sm:$0xff] }
  0x87   :  { %v308_v61 = vld [vmem:[#allocation5 + $0x790] sm:$0xff] }
  0x8b   :  { %1003 = vmatpush1.bf16.xpose.msra.mxu0 %v1002_v7  ;;  %v68_v7 = vld [vmem:[#allocation5 + $0x10] sm:$0xff] }
  0x8c   :  { %1195 = vmatpush1.bf16.xpose.msra.mxu1 %v1194_v8  ;;  %1005 = vmatprep.subr.bf16.mxu0 %v1004_v9  ;;  %v74_v8 = vld [vmem:[#allocation5 + $0x40] sm:$0xff]  ;;  %v260_v9 = vld [vmem:[#allocation5 + $0x610] sm:$0xff] }
  0x8d   :  { %1197 = vmatprep.subr.bf16.mxu1 %v1196_v10  ;;  %v266_v10 = vld [vmem:[#allocation5 + $0x640] sm:$0xff]  ;;  %v1026_v16 = vpack.c.bf16 %v74_v8, %v68_v7  ;;  %v128_v7 = vld [vmem:[#allocation5 + $0x1f0] sm:$0xff] }
  0x8e   :  { %v1218_v17 = vpack.c.bf16 %v266_v10, %v260_v9  ;;  %v134_v8 = vld [vmem:[#allocation5 + $0x220] sm:$0xff]  ;;  %v320_v9 = vld [vmem:[#allocation5 + $0x7f0] sm:$0xff] }
  0x8f   :  { %v326_v10 = vld [vmem:[#allocation5 + $0x820] sm:$0xff] }
  0x93   :  { %1007 = vmatpush1.bf16.xpose.msra.mxu0 %v1006_v19  ;;  %v1220_v19 = vpack.c.bf16 %v279_v14, %v273_v13  ;;  %v333_v13 = vld [vmem:[#allocation5 + $0x858] sm:$0xff]  ;;  %v339_v14 = vld [vmem:[#allocation5 + $0x888] sm:$0xff] }
  0x94   :  { %1199 = vmatpush1.bf16.xpose.msra.mxu1 %v1198_v20  ;;  %1009 = vmatprep.subr.bf16.mxu0 %v1008_v21  ;;  %v61_v20 = vld [vmem:[#allocation2 + $0x38] sm:$0xff]  ;;  %v80_v21 = vld [vmem:[#allocation5 + $0x70] sm:$0xff] }
  0x95   :  { %1201 = vmatprep.subr.bf16.mxu1 %v1200_v22  ;;  %v60_v22 = vld [vmem:[#allocation2 + $0x30] sm:$0xff] }
  0x9b   :  { %1011 = vmatpush1.bf16.xpose.msra.mxu0 %v1010_v31  ;;  %v1030_v31 = vpack.c.bf16 %v86_v23, %v80_v21  ;;  %v332_v21 = vld [vmem:[#allocation5 + $0x850] sm:$0xff]  ;;  %v153_v23 = vld [vmem:[#allocation5 + $0x2b8] sm:$0xff] }
  0x9c   :  { %1203 = vmatpush1.bf16.xpose.msra.mxu1 %v1202_v32  ;;  %1013 = vmatprep.subr.bf16.mxu0 %v1012_v33  ;;  %v1222_v32 = vpack.c.bf16 %v278_v26, %v272_v24  ;;  %v1032_v33 = vpack.c.bf16 %v99_v28, %v93_v27  ;;  %v159_v24 = vld [vmem:[#allocation5 + $0x2e8] sm:$0xff] }
  0x9d   :  { %1205 = vmatprep.subr.bf16.mxu1 %v1204_v34  ;;  %v1224_v34 = vpack.c.bf16 %v291_v30, %v285_v29  ;;  %v351_v26 = vld [vmem:[#allocation5 + $0x8e8] sm:$0xff]  ;;  %v1052_v29 = vpack.c.bf16 %v159_v24, %v153_v23 }
  0xa3   :  { %1015 = vmatpush1.bf16.xpose.msra.mxu0 %v1014_v43  ;;  %v1034_v43 = vpack.c.bf16 %v98_v36, %v92_v35  ;;  %v165_v35 = vld [vmem:[#allocation5 + $0x318] sm:$0xff]  ;;  %v171_v36 = vld [vmem:[#allocation5 + $0x348] sm:$0xff] }
  0xa4   :  { %1207 = vmatpush1.bf16.xpose.msra.mxu1 %v1206_v44  ;;  %1017 = vmatprep.subr.bf16.mxu0 %v1016_v45  ;;  %v1226_v44 = vpack.c.bf16 %v290_v38, %v284_v37  ;;  %v1036_v45 = vpack.c.bf16 %v111_v40, %v105_v39  ;;  %v357_v37 = vld [vmem:[#allocation5 + $0x918] sm:$0xff]  ;;  %v363_v38 = vld [vmem:[#allocation5 + $0x948] sm:$0xff] }
  0xa5   :  { %1209 = vmatprep.subr.bf16.mxu1 %v1208_v46  ;;  %v1228_v46 = vpack.c.bf16 %v303_v42, %v297_v41  ;;  %v1056_v41 = vpack.c.bf16 %v171_v36, %v165_v35  ;;  %v1248_v42 = vpack.c.bf16 %v363_v38, %v357_v37 }
  0xab   :  { %1019 = vmatpush1.bf16.xpose.msra.mxu0 %v1018_v55  ;;  %v1038_v55 = vpack.c.bf16 %v110_v48, %v104_v47  ;;  %v177_v47 = vld [vmem:[#allocation5 + $0x378] sm:$0xff]  ;;  %v183_v48 = vld [vmem:[#allocation5 + $0x3a8] sm:$0xff] }
  0xac   :  { %1211 = vmatpush1.bf16.xpose.msra.mxu1 %v1210_v56  ;;  %1021 = vmatprep.subr.bf16.mxu0 %v1020_v57  ;;  %v1230_v56 = vpack.c.bf16 %v302_v50, %v296_v49  ;;  %v1040_v57 = vpack.c.bf16 %v123_v52, %v117_v51  ;;  %v369_v49 = vld [vmem:[#allocation5 + $0x978] sm:$0xff]  ;;  %v375_v50 = vld [vmem:[#allocation5 + $0x9a8] sm:$0xff] }
  0xad   :  { %1213 = vmatprep.subr.bf16.mxu1 %v1212_v58  ;;  %v1232_v58 = vpack.c.bf16 %v315_v54, %v309_v53  ;;  %v1060_v53 = vpack.c.bf16 %v183_v48, %v177_v47  ;;  %v1252_v54 = vpack.c.bf16 %v375_v50, %v369_v49 }
  0xb3   :  { %1023 = vmatpush1.bf16.xpose.msra.mxu0 %v1022_v3  ;;  %v1042_v3 = vpack.c.bf16 %v122_v60, %v116_v59  ;;  %v189_v59 = vld [vmem:[#allocation5 + $0x3d8] sm:$0xff]  ;;  %v195_v60 = vld [vmem:[#allocation5 + $0x408] sm:$0xff] }
  0xb4   :  { %1215 = vmatpush1.bf16.xpose.msra.mxu1 %v1214_v4  ;;  %1025 = vmatprep.subr.bf16.mxu0 %v1024_v5  ;;  %v1234_v4 = vpack.c.bf16 %v314_v62, %v308_v61  ;;  %v1044_v5 = vpack.c.bf16 %v135_v0, %v129_v63  ;;  %v381_v61 = vld [vmem:[#allocation5 + $0x9d8] sm:$0xff]  ;;  %v387_v62 = vld [vmem:[#allocation5 + $0xa08] sm:$0xff] }
  0xb5   :  { %1217 = vmatprep.subr.bf16.mxu1 %v1216_v6  ;;  %v1236_v6 = vpack.c.bf16 %v327_v2, %v321_v1  ;;  %v1064_v1 = vpack.c.bf16 %v195_v60, %v189_v59  ;;  %v1256_v2 = vpack.c.bf16 %v387_v62, %v381_v61 }
  0xba   :  { %537 = vmatmul.mubr.f32.vlgmr.msra.gmra.mrb[0].mxu0 %v54_v15 }
  0xbb   :  { %1027 = vmatpush1.bf16.xpose.msra.mxu0 %v1026_v16  ;;  %768 = vmatmul.mubr.f32.vlgmr.msra.gmra.mrb[0].mxu1 %v54_v15  ;;  %v1046_v15 = vpack.c.bf16 %v134_v8, %v128_v7  ;;  %v1238_v16 = vpack.c.bf16 %v326_v10, %v320_v9  ;;  %v201_v7 = vld [vmem:[#allocation5 + $0x438] sm:$0xff]  ;;  %v207_v8 = vld [vmem:[#allocation5 + $0x468] sm:$0xff] }
  0xbc   :  { %1219 = vmatpush1.bf16.xpose.msra.mxu1 %v1218_v17  ;;  %1029 = vmatprep.subr.bf16.mxu0 %v1028_v18  ;;  %v1048_v17 = vpack.c.bf16 %v147_v12, %v141_v11  ;;  %v1240_v18 = vpack.c.bf16 %v339_v14, %v333_v13  ;;  %v393_v9 = vld [vmem:[#allocation5 + $0xa38] sm:$0xff]  ;;  %v399_v10 = vld [vmem:[#allocation5 + $0xa68] sm:$0xff]  ;;  %v1068_v13 = vpack.c.bf16 %v207_v8, %v201_v7 }
  0xbd   :  { %1221 = vmatprep.subr.bf16.mxu1 %v1220_v19  ;;  %542 = vmatprep.mubr.f32.mxu0 %v61_v20  ;;  %v140_v19 = vld [vmem:[#allocation5 + $0x250] sm:$0xff]  ;;  %v1260_v14 = vpack.c.bf16 %v399_v10, %v393_v9 }
  0xbe   :  { %773 = vmatprep.mubr.f32.mxu1 %v61_v20  ;;  %543 = vmatmul.mubr.f32.gmra.mrb[2].mxu0 %v60_v22  ;;  %v146_v20 = vld [vmem:[#allocation5 + $0x280] sm:$0xff] }
  0xbf   :  { %774 = vmatmul.mubr.f32.gmra.mrb[2].mxu1 %v60_v22  ;;  %613 = vmatprep.mubr.f32.mxu0 %v57_v25  ;;  %v338_v22 = vld [vmem:[#allocation5 + $0x880] sm:$0xff]  ;;  %v1050_v27 = vpack.c.bf16 %v146_v20, %v140_v19  ;;  %v213_v19 = vld [vmem:[#allocation5 + $0x498] sm:$0xff]  ;;  %v219_v20 = vld [vmem:[#allocation5 + $0x4c8] sm:$0xff] }
  0xc0   :  { %844 = vmatprep.mubr.f32.mxu1 %v57_v25  ;;  %v345_v25 = vld [vmem:[#allocation5 + $0x8b8] sm:$0xff]  ;;  %v1242_v28 = vpack.c.bf16 %v338_v22, %v332_v21  ;;  %v411_v22 = vld [vmem:[#allocation5 + $0xac8] sm:$0xff] }
  0xc1   :  { %v1244_v30 = vpack.c.bf16 %v351_v26, %v345_v25  ;;  %v405_v21 = vld [vmem:[#allocation5 + $0xa98] sm:$0xff]  ;;  %v1072_v25 = vpack.c.bf16 %v219_v20, %v213_v19  ;;  %v56_v19 = vld [vmem:[#allocation2 + $0x10] sm:$0xff] }
  0xc2   :  { %v1264_v26 = vpack.c.bf16 %v411_v22, %v405_v21 }
  0xc3   :  { %1031 = vmatpush1.bf16.xpose.msra.mxu0 %v1030_v31  ;;  %v152_v31 = vld [vmem:[#allocation5 + $0x2b0] sm:$0xff] }
  0xc4   :  { %1223 = vmatpush1.bf16.xpose.msra.mxu1 %v1222_v32  ;;  %1033 = vmatprep.subr.bf16.mxu0 %v1032_v33  ;;  %v158_v32 = vld [vmem:[#allocation5 + $0x2e0] sm:$0xff]  ;;  %v344_v33 = vld [vmem:[#allocation5 + $0x8b0] sm:$0xff] }
  0xc5   :  { %1225 = vmatprep.subr.bf16.mxu1 %v1224_v34  ;;  %v350_v34 = vld [vmem:[#allocation5 + $0x8e0] sm:$0xff]  ;;  %v1054_v39 = vpack.c.bf16 %v158_v32, %v152_v31  ;;  %v225_v31 = vld [vmem:[#allocation5 + $0x4f8] sm:$0xff]  ;;  %v231_v32 = vld [vmem:[#allocation5 + $0x528] sm:$0xff] }
  0xc6   :  { %v1246_v40 = vpack.c.bf16 %v350_v34, %v344_v33  ;;  %v417_v33 = vld [vmem:[#allocation5 + $0xaf8] sm:$0xff]  ;;  %v423_v34 = vld [vmem:[#allocation5 + $0xb28] sm:$0xff]  ;;  %v1076_v37 = vpack.c.bf16 %v231_v32, %v225_v31 }
  0xc7   :  { %v1268_v38 = vpack.c.bf16 %v423_v34, %v417_v33  ;;  %v95_v31 = vld [vmem:[#allocation5 + $0xe8] sm:$0xff]  ;;  %v101_v32 = vld [vmem:[#allocation5 + $0x118] sm:$0xff] }
  0xc8   :  { %v287_v33 = vld [vmem:[#allocation5 + $0x6e8] sm:$0xff]  ;;  %v293_v34 = vld [vmem:[#allocation5 + $0x718] sm:$0xff] }
  0xcb   :  { %1035 = vmatpush1.bf16.xpose.msra.mxu0 %v1034_v43  ;;  %v164_v43 = vld [vmem:[#allocation5 + $0x310] sm:$0xff] }
  0xcc   :  { %1227 = vmatpush1.bf16.xpose.msra.mxu1 %v1226_v44  ;;  %1037 = vmatprep.subr.bf16.mxu0 %v1036_v45  ;;  %v170_v44 = vld [vmem:[#allocation5 + $0x340] sm:$0xff]  ;;  %v356_v45 = vld [vmem:[#allocation5 + $0x910] sm:$0xff] }
  0xcd   :  { %1229 = vmatprep.subr.bf16.mxu1 %v1228_v46  ;;  %v362_v46 = vld [vmem:[#allocation5 + $0x940] sm:$0xff]  ;;  %v1058_v51 = vpack.c.bf16 %v170_v44, %v164_v43  ;;  %v237_v43 = vld [vmem:[#allocation5 + $0x558] sm:$0xff]  ;;  %v243_v44 = vld [vmem:[#allocation5 + $0x588] sm:$0xff] }
  0xce   :  { %v1250_v52 = vpack.c.bf16 %v362_v46, %v356_v45  ;;  %v429_v45 = vld [vmem:[#allocation5 + $0xb58] sm:$0xff]  ;;  %v435_v46 = vld [vmem:[#allocation5 + $0xb88] sm:$0xff]  ;;  %v1080_v49 = vpack.c.bf16 %v243_v44, %v237_v43 }
  0xcf   :  { %v1272_v50 = vpack.c.bf16 %v435_v46, %v429_v45  ;;  %v107_v43 = vld [vmem:[#allocation5 + $0x148] sm:$0xff]  ;;  %v113_v44 = vld [vmem:[#allocation5 + $0x178] sm:$0xff] }
  0xd0   :  { %v299_v45 = vld [vmem:[#allocation5 + $0x748] sm:$0xff]  ;;  %v305_v46 = vld [vmem:[#allocation5 + $0x778] sm:$0xff] }
  0xd3   :  { %1039 = vmatpush1.bf16.xpose.msra.mxu0 %v1038_v55  ;;  %v176_v55 = vld [vmem:[#allocation5 + $0x370] sm:$0xff] }
  0xd4   :  { %1231 = vmatpush1.bf16.xpose.msra.mxu1 %v1230_v56  ;;  %1041 = vmatprep.subr.bf16.mxu0 %v1040_v57  ;;  %v182_v56 = vld [vmem:[#allocation5 + $0x3a0] sm:$0xff]  ;;  %v368_v57 = vld [vmem:[#allocation5 + $0x970] sm:$0xff] }
  0xd5   :  { %1233 = vmatprep.subr.bf16.mxu1 %v1232_v58  ;;  %v374_v58 = vld [vmem:[#allocation5 + $0x9a0] sm:$0xff]  ;;  %v1062_v63 = vpack.c.bf16 %v182_v56, %v176_v55  ;;  %v249_v55 = vld [vmem:[#allocation5 + $0x5b8] sm:$0xff]  ;;  %v255_v56 = vld [vmem:[#allocation5 + $0x5e8] sm:$0xff] }
  0xd6   :  { %v1254_v0 = vpack.c.bf16 %v374_v58, %v368_v57  ;;  %v441_v57 = vld [vmem:[#allocation5 + $0xbb8] sm:$0xff]  ;;  %v447_v58 = vld [vmem:[#allocation5 + $0xbe8] sm:$0xff]  ;;  %v1084_v61 = vpack.c.bf16 %v255_v56, %v249_v55 }
  0xd7   :  { %v1276_v62 = vpack.c.bf16 %v447_v58, %v441_v57  ;;  %v119_v55 = vld [vmem:[#allocation5 + $0x1a8] sm:$0xff]  ;;  %v125_v56 = vld [vmem:[#allocation5 + $0x1d8] sm:$0xff] }
  0xd8   :  { %v311_v57 = vld [vmem:[#allocation5 + $0x7a8] sm:$0xff]  ;;  %v317_v58 = vld [vmem:[#allocation5 + $0x7d8] sm:$0xff] }
  0xdb   :  { %1043 = vmatpush1.bf16.xpose.msra.mxu0 %v1042_v3  ;;  %v188_v3 = vld [vmem:[#allocation5 + $0x3d0] sm:$0xff] }
  0xdc   :  { %1235 = vmatpush1.bf16.xpose.msra.mxu1 %v1234_v4  ;;  %1045 = vmatprep.subr.bf16.mxu0 %v1044_v5  ;;  %v194_v4 = vld [vmem:[#allocation5 + $0x400] sm:$0xff]  ;;  %v380_v5 = vld [vmem:[#allocation5 + $0x9d0] sm:$0xff] }
  0xdd   :  { %1237 = vmatprep.subr.bf16.mxu1 %v1236_v6  ;;  %v386_v6 = vld [vmem:[#allocation5 + $0xa00] sm:$0xff]  ;;  %v1066_v11 = vpack.c.bf16 %v194_v4, %v188_v3  ;;  %v71_v3 = vld [vmem:[#allocation5 + $0x28] sm:$0xff]  ;;  %v77_v4 = vld [vmem:[#allocation5 + $0x58] sm:$0xff] }
  0xde   :  { %v1258_v12 = vpack.c.bf16 %v386_v6, %v380_v5  ;;  %v263_v5 = vld [vmem:[#allocation5 + $0x628] sm:$0xff]  ;;  %v269_v6 = vld [vmem:[#allocation5 + $0x658] sm:$0xff]  ;;  %v1088_v9 = vpack.c.bf16 %v77_v4, %v71_v3 }
  0xdf   :  { %v1280_v10 = vpack.c.bf16 %v269_v6, %v263_v5  ;;  %v131_v3 = vld [vmem:[#allocation5 + $0x208] sm:$0xff]  ;;  %v137_v4 = vld [vmem:[#allocation5 + $0x238] sm:$0xff] }
  0xe0   :  { %v323_v5 = vld [vmem:[#allocation5 + $0x808] sm:$0xff]  ;;  %v329_v6 = vld [vmem:[#allocation5 + $0x838] sm:$0xff] }
  0xe3   :  { %1047 = vmatpush1.bf16.xpose.msra.mxu0 %v1046_v15  ;;  %v200_v15 = vld [vmem:[#allocation5 + $0x430] sm:$0xff] }
  0xe4   :  { %1239 = vmatpush1.bf16.xpose.msra.mxu1 %v1238_v16  ;;  %1049 = vmatprep.subr.bf16.mxu0 %v1048_v17  ;;  %v206_v16 = vld [vmem:[#allocation5 + $0x460] sm:$0xff]  ;;  %v392_v17 = vld [vmem:[#allocation5 + $0xa30] sm:$0xff] }
  0xe5   :  { %1241 = vmatprep.subr.bf16.mxu1 %v1240_v18  ;;  %v398_v18 = vld [vmem:[#allocation5 + $0xa60] sm:$0xff]  ;;  %v1070_v23 = vpack.c.bf16 %v206_v16, %v200_v15  ;;  %v83_v15 = vld [vmem:[#allocation5 + $0x88] sm:$0xff]  ;;  %v89_v16 = vld [vmem:[#allocation5 + $0xb8] sm:$0xff] }
  0xe6   :  { %v1262_v24 = vpack.c.bf16 %v398_v18, %v392_v17  ;;  %v275_v17 = vld [vmem:[#allocation5 + $0x688] sm:$0xff]  ;;  %v281_v18 = vld [vmem:[#allocation5 + $0x6b8] sm:$0xff]  ;;  %v1092_v22 = vpack.c.bf16 %v89_v16, %v83_v15 }
  0xe7   :  { %v143_v15 = vld [vmem:[#allocation5 + $0x268] sm:$0xff]  ;;  %v149_v16 = vld [vmem:[#allocation5 + $0x298] sm:$0xff] }
  0xeb   :  { %1051 = vmatpush1.bf16.xpose.msra.mxu0 %v1050_v27  ;;  %v212_v27 = vld [vmem:[#allocation5 + $0x490] sm:$0xff] }
  0xec   :  { %1243 = vmatpush1.bf16.xpose.msra.mxu1 %v1242_v28  ;;  %1053 = vmatprep.subr.bf16.mxu0 %v1052_v29  ;;  %v218_v28 = vld [vmem:[#allocation5 + $0x4c0] sm:$0xff]  ;;  %v404_v29 = vld [vmem:[#allocation5 + $0xa90] sm:$0xff] }
  0xed   :  { %1245 = vmatprep.subr.bf16.mxu1 %v1244_v30  ;;  %v410_v30 = vld [vmem:[#allocation5 + $0xac0] sm:$0xff]  ;;  %v1074_v35 = vpack.c.bf16 %v218_v28, %v212_v27  ;;  %v88_v27 = vld [vmem:[#allocation5 + $0xb0] sm:$0xff] }
  0xee   :  { %v1266_v36 = vpack.c.bf16 %v410_v30, %v404_v29  ;;  %v274_v28 = vld [vmem:[#allocation5 + $0x680] sm:$0xff]  ;;  %v59_v29 = vld [vmem:[#allocation2 + $0x28] sm:$0xff]  ;;  %v280_v30 = vld [vmem:[#allocation5 + $0x6b0] sm:$0xff] }
  0xf3   :  { %1055 = vmatpush1.bf16.xpose.msra.mxu0 %v1054_v39  ;;  %v224_v39 = vld [vmem:[#allocation5 + $0x4f0] sm:$0xff] }
  0xf4   :  { %1247 = vmatpush1.bf16.xpose.msra.mxu1 %v1246_v40  ;;  %1057 = vmatprep.subr.bf16.mxu0 %v1056_v41  ;;  %v230_v40 = vld [vmem:[#allocation5 + $0x520] sm:$0xff]  ;;  %v416_v41 = vld [vmem:[#allocation5 + $0xaf0] sm:$0xff] }
  0xf5   :  { %1249 = vmatprep.subr.bf16.mxu1 %v1248_v42  ;;  %v422_v42 = vld [vmem:[#allocation5 + $0xb20] sm:$0xff]  ;;  %v1078_v47 = vpack.c.bf16 %v230_v40, %v224_v39  ;;  %v100_v40 = vld [vmem:[#allocation5 + $0x110] sm:$0xff] }
  0xf6   :  { %v1270_v48 = vpack.c.bf16 %v422_v42, %v416_v41  ;;  %v94_v39 = vld [vmem:[#allocation5 + $0xe0] sm:$0xff]  ;;  %v292_v42 = vld [vmem:[#allocation5 + $0x710] sm:$0xff] }
  0xf7   :  { %v286_v41 = vld [vmem:[#allocation5 + $0x6e0] sm:$0xff] }
  0xfb   :  { %1059 = vmatpush1.bf16.xpose.msra.mxu0 %v1058_v51  ;;  %v236_v51 = vld [vmem:[#allocation5 + $0x550] sm:$0xff] }
  0xfc   :  { %1251 = vmatpush1.bf16.xpose.msra.mxu1 %v1250_v52  ;;  %1061 = vmatprep.subr.bf16.mxu0 %v1060_v53  ;;  %v242_v52 = vld [vmem:[#allocation5 + $0x580] sm:$0xff]  ;;  %v428_v53 = vld [vmem:[#allocation5 + $0xb50] sm:$0xff] }
  0xfd   :  { %1253 = vmatprep.subr.bf16.mxu1 %v1252_v54  ;;  %v434_v54 = vld [vmem:[#allocation5 + $0xb80] sm:$0xff]  ;;  %v1082_v59 = vpack.c.bf16 %v242_v52, %v236_v51  ;;  %v112_v52 = vld [vmem:[#allocation5 + $0x170] sm:$0xff] }
  0xfe   :  { %v1274_v60 = vpack.c.bf16 %v434_v54, %v428_v53  ;;  %v106_v51 = vld [vmem:[#allocation5 + $0x140] sm:$0xff]  ;;  %v304_v54 = vld [vmem:[#allocation5 + $0x770] sm:$0xff] }
  0xff   :  { %v298_v53 = vld [vmem:[#allocation5 + $0x740] sm:$0xff] }
 0x103   :  { %1063 = vmatpush1.bf16.xpose.msra.mxu0 %v1062_v63  ;;  %v248_v63 = vld [vmem:[#allocation5 + $0x5b0] sm:$0xff] }
 0x104   :  { %1255 = vmatpush1.bf16.xpose.msra.mxu1 %v1254_v0  ;;  %1065 = vmatprep.subr.bf16.mxu0 %v1064_v1  ;;  %v254_v0 = vld [vmem:[#allocation5 + $0x5e0] sm:$0xff]  ;;  %v440_v1 = vld [vmem:[#allocation5 + $0xbb0] sm:$0xff] }
 0x105   :  { %1257 = vmatprep.subr.bf16.mxu1 %v1256_v2  ;;  %v446_v2 = vld [vmem:[#allocation5 + $0xbe0] sm:$0xff]  ;;  %v1086_v7 = vpack.c.bf16 %v254_v0, %v248_v63  ;;  %v124_v0 = vld [vmem:[#allocation5 + $0x1d0] sm:$0xff] }
 0x106   :  { %v1278_v8 = vpack.c.bf16 %v446_v2, %v440_v1  ;;  %v118_v63 = vld [vmem:[#allocation5 + $0x1a0] sm:$0xff]  ;;  %v316_v2 = vld [vmem:[#allocation5 + $0x7d0] sm:$0xff] }
 0x107   :  { %v310_v1 = vld [vmem:[#allocation5 + $0x7a0] sm:$0xff] }
 0x10b   :  { %1067 = vmatpush1.bf16.xpose.msra.mxu0 %v1066_v11  ;;  %v70_v11 = vld [vmem:[#allocation5 + $0x20] sm:$0xff] }
 0x10c   :  { %1259 = vmatpush1.bf16.xpose.msra.mxu1 %v1258_v12  ;;  %1069 = vmatprep.subr.bf16.mxu0 %v1068_v13  ;;  %v76_v12 = vld [vmem:[#allocation5 + $0x50] sm:$0xff]  ;;  %v262_v13 = vld [vmem:[#allocation5 + $0x620] sm:$0xff] }
 0x10d   :  { %1261 = vmatprep.subr.bf16.mxu1 %v1260_v14  ;;  %v268_v14 = vld [vmem:[#allocation5 + $0x650] sm:$0xff]  ;;  %v1090_v20 = vpack.c.bf16 %v76_v12, %v70_v11  ;;  %v130_v11 = vld [vmem:[#allocation5 + $0x200] sm:$0xff] }
 0x10e   :  { %v1282_v21 = vpack.c.bf16 %v268_v14, %v262_v13  ;;  %v136_v12 = vld [vmem:[#allocation5 + $0x230] sm:$0xff]  ;;  %v322_v13 = vld [vmem:[#allocation5 + $0x800] sm:$0xff] }
 0x10f   :  { %v328_v14 = vld [vmem:[#allocation5 + $0x830] sm:$0xff] }
 0x113   :  { %1071 = vmatpush1.bf16.xpose.msra.mxu0 %v1070_v23  ;;  %v1284_v23 = vpack.c.bf16 %v281_v18, %v275_v17  ;;  %v335_v17 = vld [vmem:[#allocation5 + $0x868] sm:$0xff]  ;;  %v341_v18 = vld [vmem:[#allocation5 + $0x898] sm:$0xff] }
 0x114   :  { %1263 = vmatpush1.bf16.xpose.msra.mxu1 %v1262_v24  ;;  %1073 = vmatprep.subr.bf16.mxu0 %v1072_v25  ;;  %v63_v24 = vld [vmem:[#allocation2 + $0x48] sm:$0xff]  ;;  %v82_v25 = vld [vmem:[#allocation5 + $0x80] sm:$0xff] }
 0x115   :  { %1265 = vmatprep.subr.bf16.mxu1 %v1264_v26  ;;  %v62_v26 = vld [vmem:[#allocation2 + $0x40] sm:$0xff] }
 0x11b   :  { %1075 = vmatpush1.bf16.xpose.msra.mxu0 %v1074_v35  ;;  %v1094_v35 = vpack.c.bf16 %v88_v27, %v82_v25  ;;  %v334_v25 = vld [vmem:[#allocation5 + $0x860] sm:$0xff]  ;;  %v155_v27 = vld [vmem:[#allocation5 + $0x2c8] sm:$0xff] }
 0x11c   :  { %1267 = vmatpush1.bf16.xpose.msra.mxu1 %v1266_v36  ;;  %1077 = vmatprep.subr.bf16.mxu0 %v1076_v37  ;;  %v1286_v36 = vpack.c.bf16 %v280_v30, %v274_v28  ;;  %v1096_v37 = vpack.c.bf16 %v101_v32, %v95_v31  ;;  %v161_v28 = vld [vmem:[#allocation5 + $0x2f8] sm:$0xff] }
 0x11d   :  { %1269 = vmatprep.subr.bf16.mxu1 %v1268_v38  ;;  %v1288_v38 = vpack.c.bf16 %v293_v34, %v287_v33  ;;  %v353_v30 = vld [vmem:[#allocation5 + $0x8f8] sm:$0xff]  ;;  %v1116_v33 = vpack.c.bf16 %v161_v28, %v155_v27 }
 0x123   :  { %1079 = vmatpush1.bf16.xpose.msra.mxu0 %v1078_v47  ;;  %v1098_v47 = vpack.c.bf16 %v100_v40, %v94_v39  ;;  %v167_v39 = vld [vmem:[#allocation5 + $0x328] sm:$0xff]  ;;  %v173_v40 = vld [vmem:[#allocation5 + $0x358] sm:$0xff] }
 0x124   :  { %1271 = vmatpush1.bf16.xpose.msra.mxu1 %v1270_v48  ;;  %1081 = vmatprep.subr.bf16.mxu0 %v1080_v49  ;;  %v1290_v48 = vpack.c.bf16 %v292_v42, %v286_v41  ;;  %v1100_v49 = vpack.c.bf16 %v113_v44, %v107_v43  ;;  %v359_v41 = vld [vmem:[#allocation5 + $0x928] sm:$0xff]  ;;  %v365_v42 = vld [vmem:[#allocation5 + $0x958] sm:$0xff] }
 0x125   :  { %1273 = vmatprep.subr.bf16.mxu1 %v1272_v50  ;;  %v1292_v50 = vpack.c.bf16 %v305_v46, %v299_v45  ;;  %v1120_v45 = vpack.c.bf16 %v173_v40, %v167_v39  ;;  %v1312_v46 = vpack.c.bf16 %v365_v42, %v359_v41 }
 0x12b   :  { %1083 = vmatpush1.bf16.xpose.msra.mxu0 %v1082_v59  ;;  %v1102_v59 = vpack.c.bf16 %v112_v52, %v106_v51  ;;  %v179_v51 = vld [vmem:[#allocation5 + $0x388] sm:$0xff]  ;;  %v185_v52 = vld [vmem:[#allocation5 + $0x3b8] sm:$0xff] }
 0x12c   :  { %1275 = vmatpush1.bf16.xpose.msra.mxu1 %v1274_v60  ;;  %1085 = vmatprep.subr.bf16.mxu0 %v1084_v61  ;;  %v1294_v60 = vpack.c.bf16 %v304_v54, %v298_v53  ;;  %v1104_v61 = vpack.c.bf16 %v125_v56, %v119_v55  ;;  %v371_v53 = vld [vmem:[#allocation5 + $0x988] sm:$0xff]  ;;  %v377_v54 = vld [vmem:[#allocation5 + $0x9b8] sm:$0xff] }
 0x12d   :  { %1277 = vmatprep.subr.bf16.mxu1 %v1276_v62  ;;  %v1296_v62 = vpack.c.bf16 %v317_v58, %v311_v57  ;;  %v1124_v57 = vpack.c.bf16 %v185_v52, %v179_v51  ;;  %v1316_v58 = vpack.c.bf16 %v377_v54, %v371_v53 }
 0x133   :  { %1087 = vmatpush1.bf16.xpose.msra.mxu0 %v1086_v7  ;;  %v1106_v7 = vpack.c.bf16 %v124_v0, %v118_v63  ;;  %v191_v63 = vld [vmem:[#allocation5 + $0x3e8] sm:$0xff]  ;;  %v197_v0 = vld [vmem:[#allocation5 + $0x418] sm:$0xff] }
 0x134   :  { %1279 = vmatpush1.bf16.xpose.msra.mxu1 %v1278_v8  ;;  %1089 = vmatprep.subr.bf16.mxu0 %v1088_v9  ;;  %v1298_v8 = vpack.c.bf16 %v316_v2, %v310_v1  ;;  %v1108_v9 = vpack.c.bf16 %v137_v4, %v131_v3  ;;  %v383_v1 = vld [vmem:[#allocation5 + $0x9e8] sm:$0xff]  ;;  %v389_v2 = vld [vmem:[#allocation5 + $0xa18] sm:$0xff] }
 0x135   :  { %1281 = vmatprep.subr.bf16.mxu1 %v1280_v10  ;;  %v1300_v10 = vpack.c.bf16 %v329_v6, %v323_v5  ;;  %v1128_v5 = vpack.c.bf16 %v197_v0, %v191_v63  ;;  %v1320_v6 = vpack.c.bf16 %v389_v2, %v383_v1 }
 0x13a   :  { %614 = vmatmul.mubr.f32.vlgmr.msra.gmra.mrb[0].mxu0 %v56_v19 }
 0x13b   :  { %1091 = vmatpush1.bf16.xpose.msra.mxu0 %v1090_v20  ;;  %845 = vmatmul.mubr.f32.vlgmr.msra.gmra.mrb[0].mxu1 %v56_v19  ;;  %v1110_v19 = vpack.c.bf16 %v136_v12, %v130_v11  ;;  %v1302_v20 = vpack.c.bf16 %v328_v14, %v322_v13  ;;  %v203_v11 = vld [vmem:[#allocation5 + $0x448] sm:$0xff]  ;;  %v209_v12 = vld [vmem:[#allocation5 + $0x478] sm:$0xff] }
 0x13c   :  { %1283 = vmatpush1.bf16.xpose.msra.mxu1 %v1282_v21  ;;  %1093 = vmatprep.subr.bf16.mxu0 %v1092_v22  ;;  %v1112_v21 = vpack.c.bf16 %v149_v16, %v143_v15  ;;  %v1304_v22 = vpack.c.bf16 %v341_v18, %v335_v17  ;;  %v395_v13 = vld [vmem:[#allocation5 + $0xa48] sm:$0xff]  ;;  %v401_v14 = vld [vmem:[#allocation5 + $0xa78] sm:$0xff]  ;;  %v1132_v17 = vpack.c.bf16 %v209_v12, %v203_v11  ;;  %v64_v11 = vld [vmem:[#allocation2 + $0x50] sm:$0xff]  ;;  %v452_v12 = vlaneseq }
 0x13d   :  { %1285 = vmatprep.subr.bf16.mxu1 %v1284_v23  ;;  %619 = vmatprep.mubr.f32.mxu0 %v63_v24  ;;  %v142_v23 = vld [vmem:[#allocation5 + $0x260] sm:$0xff]  ;;  %v1324_v18 = vpack.c.bf16 %v401_v14, %v395_v13 }
 0x13e   :  { %850 = vmatprep.mubr.f32.mxu1 %v63_v24  ;;  %620 = vmatmul.mubr.f32.gmra.mrb[2].mxu0 %v62_v26  ;;  %v148_v24 = vld [vmem:[#allocation5 + $0x290] sm:$0xff]  ;;  %v453_v13 = vshrl.u32 %v452_v12, 7 }
 0x13f   :  { %851 = vmatmul.mubr.f32.gmra.mrb[2].mxu1 %v62_v26  ;;  %690 = vmatprep.mubr.f32.mxu0 %v59_v29  ;;  %v340_v26 = vld [vmem:[#allocation5 + $0x890] sm:$0xff]  ;;  %v1114_v31 = vpack.c.bf16 %v148_v24, %v142_v23  ;;  %v215_v23 = vld [vmem:[#allocation5 + $0x4a8] sm:$0xff]  ;;  %v221_v24 = vld [vmem:[#allocation5 + $0x4d8] sm:$0xff] }
 0x140   :  { %921 = vmatprep.mubr.f32.mxu1 %v59_v29  ;;  %v347_v29 = vld [vmem:[#allocation5 + $0x8c8] sm:$0xff]  ;;  %v1306_v32 = vpack.c.bf16 %v340_v26, %v334_v25  ;;  %v413_v26 = vld [vmem:[#allocation5 + $0xad8] sm:$0xff]  ;;  %v454_v14 = vsub.s32 0, %v453_v13 }
 0x141   :  { %v1308_v34 = vpack.c.bf16 %v353_v30, %v347_v29  ;;  %v407_v25 = vld [vmem:[#allocation5 + $0xaa8] sm:$0xff]  ;;  %v1136_v29 = vpack.c.bf16 %v221_v24, %v215_v23 }
 0x142   :  { %v1328_v30 = vpack.c.bf16 %v413_v26, %v407_v25 }
 0x143   :  { %1095 = vmatpush1.bf16.xpose.msra.mxu0 %v1094_v35  ;;  %v154_v35 = vld [vmem:[#allocation5 + $0x2c0] sm:$0xff] }
 0x144   :  { %1287 = vmatpush1.bf16.xpose.msra.mxu1 %v1286_v36  ;;  %1097 = vmatprep.subr.bf16.mxu0 %v1096_v37  ;;  %v160_v36 = vld [vmem:[#allocation5 + $0x2f0] sm:$0xff]  ;;  %v346_v37 = vld [vmem:[#allocation5 + $0x8c0] sm:$0xff] }
 0x145   :  { %1289 = vmatprep.subr.bf16.mxu1 %v1288_v38  ;;  %v352_v38 = vld [vmem:[#allocation5 + $0x8f0] sm:$0xff]  ;;  %v1118_v43 = vpack.c.bf16 %v160_v36, %v154_v35  ;;  %v227_v35 = vld [vmem:[#allocation5 + $0x508] sm:$0xff]  ;;  %v233_v36 = vld [vmem:[#allocation5 + $0x538] sm:$0xff] }
 0x146   :  { %v1310_v44 = vpack.c.bf16 %v352_v38, %v346_v37  ;;  %v419_v37 = vld [vmem:[#allocation5 + $0xb08] sm:$0xff]  ;;  %v425_v38 = vld [vmem:[#allocation5 + $0xb38] sm:$0xff]  ;;  %v1140_v41 = vpack.c.bf16 %v233_v36, %v227_v35 }
 0x147   :  { %v1332_v42 = vpack.c.bf16 %v425_v38, %v419_v37 }
 0x14b   :  { %1099 = vmatpush1.bf16.xpose.msra.mxu0 %v1098_v47  ;;  %v166_v47 = vld [vmem:[#allocation5 + $0x320] sm:$0xff] }
 0x14c   :  { %1291 = vmatpush1.bf16.xpose.msra.mxu1 %v1290_v48  ;;  %1101 = vmatprep.subr.bf16.mxu0 %v1100_v49  ;;  %v172_v48 = vld [vmem:[#allocation5 + $0x350] sm:$0xff]  ;;  %v358_v49 = vld [vmem:[#allocation5 + $0x920] sm:$0xff] }
 0x14d   :  { %1293 = vmatprep.subr.bf16.mxu1 %v1292_v50  ;;  %v364_v50 = vld [vmem:[#allocation5 + $0x950] sm:$0xff]  ;;  %v1122_v55 = vpack.c.bf16 %v172_v48, %v166_v47  ;;  %v239_v47 = vld [vmem:[#allocation5 + $0x568] sm:$0xff]  ;;  %v245_v48 = vld [vmem:[#allocation5 + $0x598] sm:$0xff] }
 0x14e   :  { %v1314_v56 = vpack.c.bf16 %v364_v50, %v358_v49  ;;  %v431_v49 = vld [vmem:[#allocation5 + $0xb68] sm:$0xff]  ;;  %v437_v50 = vld [vmem:[#allocation5 + $0xb98] sm:$0xff]  ;;  %v1144_v53 = vpack.c.bf16 %v245_v48, %v239_v47 }
 0x14f   :  { %v1336_v54 = vpack.c.bf16 %v437_v50, %v431_v49 }
 0x153   :  { %1103 = vmatpush1.bf16.xpose.msra.mxu0 %v1102_v59  ;;  %v178_v59 = vld [vmem:[#allocation5 + $0x380] sm:$0xff] }
 0x154   :  { %1295 = vmatpush1.bf16.xpose.msra.mxu1 %v1294_v60  ;;  %1105 = vmatprep.subr.bf16.mxu0 %v1104_v61  ;;  %v184_v60 = vld [vmem:[#allocation5 + $0x3b0] sm:$0xff]  ;;  %v370_v61 = vld [vmem:[#allocation5 + $0x980] sm:$0xff] }
 0x155   :  { %1297 = vmatprep.subr.bf16.mxu1 %v1296_v62  ;;  %v376_v62 = vld [vmem:[#allocation5 + $0x9b0] sm:$0xff]  ;;  %v1126_v3 = vpack.c.bf16 %v184_v60, %v178_v59  ;;  %v251_v59 = vld [vmem:[#allocation5 + $0x5c8] sm:$0xff]  ;;  %v257_v60 = vld [vmem:[#allocation5 + $0x5f8] sm:$0xff] }
 0x156   :  { %v1318_v4 = vpack.c.bf16 %v376_v62, %v370_v61  ;;  %v443_v61 = vld [vmem:[#allocation5 + $0xbc8] sm:$0xff]  ;;  %v449_v62 = vld [vmem:[#allocation5 + $0xbf8] sm:$0xff]  ;;  %v1148_v1 = vpack.c.bf16 %v257_v60, %v251_v59 }
 0x157   :  { %v1340_v2 = vpack.c.bf16 %v449_v62, %v443_v61 }
 0x15b   :  { %1107 = vmatpush1.bf16.xpose.msra.mxu0 %v1106_v7  ;;  %v190_v7 = vld [vmem:[#allocation5 + $0x3e0] sm:$0xff] }
 0x15c   :  { %1299 = vmatpush1.bf16.xpose.msra.mxu1 %v1298_v8  ;;  %1109 = vmatprep.subr.bf16.mxu0 %v1108_v9  ;;  %v196_v8 = vld [vmem:[#allocation5 + $0x410] sm:$0xff]  ;;  %v382_v9 = vld [vmem:[#allocation5 + $0x9e0] sm:$0xff] }
 0x15d   :  { %1301 = vmatprep.subr.bf16.mxu1 %v1300_v10  ;;  %v388_v10 = vld [vmem:[#allocation5 + $0xa10] sm:$0xff]  ;;  %v1130_v15 = vpack.c.bf16 %v196_v8, %v190_v7 }
 0x15e   :  { %v1322_v16 = vpack.c.bf16 %v388_v10, %v382_v9  ;;  %v58_v9 = vld [vmem:[#allocation2 + $0x20] sm:$0xff]  ;;  %v65_v10 = vld [vmem:[#allocation2 + $0x58] sm:$0xff] }
 0x163   :  { %1111 = vmatpush1.bf16.xpose.msra.mxu0 %v1110_v19  ;;  %v202_v19 = vld [vmem:[#allocation5 + $0x440] sm:$0xff] }
 0x164   :  { %1303 = vmatpush1.bf16.xpose.msra.mxu1 %v1302_v20  ;;  %1113 = vmatprep.subr.bf16.mxu0 %v1112_v21  ;;  %v208_v20 = vld [vmem:[#allocation5 + $0x470] sm:$0xff]  ;;  %v394_v21 = vld [vmem:[#allocation5 + $0xa40] sm:$0xff] }
 0x165   :  { %1305 = vmatprep.subr.bf16.mxu1 %v1304_v22  ;;  %v400_v22 = vld [vmem:[#allocation5 + $0xa70] sm:$0xff]  ;;  %v1134_v27 = vpack.c.bf16 %v208_v20, %v202_v19 }
 0x166   :  { %v1326_v28 = vpack.c.bf16 %v400_v22, %v394_v21 }
 0x16b   :  { %1115 = vmatpush1.bf16.xpose.msra.mxu0 %v1114_v31  ;;  %v214_v31 = vld [vmem:[#allocation5 + $0x4a0] sm:$0xff] }
 0x16c   :  { %1307 = vmatpush1.bf16.xpose.msra.mxu1 %v1306_v32  ;;  %1117 = vmatprep.subr.bf16.mxu0 %v1116_v33  ;;  %v220_v32 = vld [vmem:[#allocation5 + $0x4d0] sm:$0xff]  ;;  %v406_v33 = vld [vmem:[#allocation5 + $0xaa0] sm:$0xff] }
 0x16d   :  { %1309 = vmatprep.subr.bf16.mxu1 %v1308_v34  ;;  %v412_v34 = vld [vmem:[#allocation5 + $0xad0] sm:$0xff]  ;;  %v1138_v39 = vpack.c.bf16 %v220_v32, %v214_v31 }
 0x16e   :  { %v1330_v40 = vpack.c.bf16 %v412_v34, %v406_v33 }
 0x173   :  { %1119 = vmatpush1.bf16.xpose.msra.mxu0 %v1118_v43  ;;  %v226_v43 = vld [vmem:[#allocation5 + $0x500] sm:$0xff] }
 0x174   :  { %1311 = vmatpush1.bf16.xpose.msra.mxu1 %v1310_v44  ;;  %1121 = vmatprep.subr.bf16.mxu0 %v1120_v45  ;;  %v232_v44 = vld [vmem:[#allocation5 + $0x530] sm:$0xff]  ;;  %v418_v45 = vld [vmem:[#allocation5 + $0xb00] sm:$0xff] }
 0x175   :  { %1313 = vmatprep.subr.bf16.mxu1 %v1312_v46  ;;  %v424_v46 = vld [vmem:[#allocation5 + $0xb30] sm:$0xff]  ;;  %v1142_v51 = vpack.c.bf16 %v232_v44, %v226_v43 }
 0x176   :  { %v1334_v52 = vpack.c.bf16 %v424_v46, %v418_v45 }
 0x17b   :  { %1123 = vmatpush1.bf16.xpose.msra.mxu0 %v1122_v55  ;;  %v238_v55 = vld [vmem:[#allocation5 + $0x560] sm:$0xff] }
 0x17c   :  { %1315 = vmatpush1.bf16.xpose.msra.mxu1 %v1314_v56  ;;  %1125 = vmatprep.subr.bf16.mxu0 %v1124_v57  ;;  %v244_v56 = vld [vmem:[#allocation5 + $0x590] sm:$0xff]  ;;  %v430_v57 = vld [vmem:[#allocation5 + $0xb60] sm:$0xff] }
 0x17d   :  { %1317 = vmatprep.subr.bf16.mxu1 %v1316_v58  ;;  %v436_v58 = vld [vmem:[#allocation5 + $0xb90] sm:$0xff]  ;;  %v1146_v63 = vpack.c.bf16 %v244_v56, %v238_v55 }
 0x17e   :  { %v1338_v0 = vpack.c.bf16 %v436_v58, %v430_v57 }
 0x183   :  { %1127 = vmatpush1.bf16.xpose.msra.mxu0 %v1126_v3  ;;  %v250_v3 = vld [vmem:[#allocation5 + $0x5c0] sm:$0xff] }
 0x184   :  { %1319 = vmatpush1.bf16.xpose.msra.mxu1 %v1318_v4  ;;  %1129 = vmatprep.subr.bf16.mxu0 %v1128_v5  ;;  %v256_v4 = vld [vmem:[#allocation5 + $0x5f0] sm:$0xff]  ;;  %v442_v5 = vld [vmem:[#allocation5 + $0xbc0] sm:$0xff] }
 0x185   :  { %1321 = vmatprep.subr.bf16.mxu1 %v1320_v6  ;;  %v448_v6 = vld [vmem:[#allocation5 + $0xbf0] sm:$0xff]  ;;  %v1150_v7 = vpack.c.bf16 %v256_v4, %v250_v3 }
 0x186   :  { %v1342_v8 = vpack.c.bf16 %v448_v6, %v442_v5 }
 0x18b   :  { %1131 = vmatpush1.bf16.xpose.msra.mxu0 %v1130_v15  ;;  %v450_v15 = vld [vmem:[#allocation7] sm:$0xf] }
 0x18c   :  { %1323 = vmatpush1.bf16.xpose.msra.mxu1 %v1322_v16  ;;  %1133 = vmatprep.subr.bf16.mxu0 %v1132_v17  ;;  %v462_v16 = vsub.s32 2, %v453_v13  ;;  %v458_v17 = vsub.s32 1, %v453_v13  ;;  %v455_v19 = vrot.slane %v450_v15, %v454_v14 }
 0x18d   :  { %1325 = vmatprep.subr.bf16.mxu1 %v1324_v18  ;;  %v466_v18 = vsub.s32 3, %v453_v13 }
 0x18e   :  { %v463_v20 = vrot.slane %v450_v15, %v462_v16  ;;  %v459_v21 = vrot.slane %v450_v15, %v458_v17 }
 0x18f   :  { %v467_v22 = vrot.slane %v450_v15, %v466_v18 }
 0x193   :  { %1135 = vmatpush1.bf16.xpose.msra.mxu0 %v1134_v27 }
 0x194   :  { %1327 = vmatpush1.bf16.xpose.msra.mxu1 %v1326_v28  ;;  %1137 = vmatprep.subr.bf16.mxu0 %v1136_v29 }
 0x195   :  { %1329 = vmatprep.subr.bf16.mxu1 %v1328_v30 }
 0x19b   :  { %1139 = vmatpush1.bf16.xpose.msra.mxu0 %v1138_v39 }
 0x19c   :  { %1331 = vmatpush1.bf16.xpose.msra.mxu1 %v1330_v40  ;;  %1141 = vmatprep.subr.bf16.mxu0 %v1140_v41 }
 0x19d   :  { %1333 = vmatprep.subr.bf16.mxu1 %v1332_v42 }
 0x1a3   :  { %1143 = vmatpush1.bf16.xpose.msra.mxu0 %v1142_v51 }
 0x1a4   :  { %1335 = vmatpush1.bf16.xpose.msra.mxu1 %v1334_v52  ;;  %1145 = vmatprep.subr.bf16.mxu0 %v1144_v53 }
 0x1a5   :  { %1337 = vmatprep.subr.bf16.mxu1 %v1336_v54 }
 0x1ab   :  { %1147 = vmatpush1.bf16.xpose.msra.mxu0 %v1146_v63 }
 0x1ac   :  { %1339 = vmatpush1.bf16.xpose.msra.mxu1 %v1338_v0  ;;  %1149 = vmatprep.subr.bf16.mxu0 %v1148_v1 }
 0x1ad   :  { %1341 = vmatprep.subr.bf16.mxu1 %v1340_v2 }
 0x1b3   :  { %1151 = vmatpush1.bf16.xpose.msra.mxu0 %v1150_v7 }
 0x1b4   :  { %1343 = vmatpush1.bf16.xpose.msra.mxu1 %v1342_v8 }
 0x1ba   :  { %691 = vmatmul.mubr.f32.vlgmr.msra.gmra.mrb[0].mxu0 %v58_v9 }
 0x1bb   :  { %922 = vmatmul.mubr.f32.vlgmr.msra.gmra.mrb[0].mxu1 %v58_v9  ;;  %696 = vmatprep.mubr.f32.mxu0 %v65_v10 }
 0x1bc   :  { %927 = vmatprep.mubr.f32.mxu1 %v65_v10 }
 0x1be   :  { %697 = vmatmul.mubr.f32.gmra.mrb[2].mxu0 %v64_v11 }
 0x1bf   :  { %928 = vmatmul.mubr.f32.gmra.mrb[2].mxu1 %v64_v11 }
 0x28d   :  { %v692_v23 = vpop.f32.mrb[0].mxu0 }
 0x28e   :  { %v1344_v24 = vadd.f32 %v692_v23, %v455_v19  ;;  %v923_v25 = vpop.f32.mrb[0].mxu1  ;;  %v694_v26 = vpop.f32.mrb[1].mxu0 }
 0x28f   :  { %v1348_v27 = vadd.f32 %v923_v25, %v463_v20  ;;  %v1345_v28 = vadd.f32 %v694_v26, %v459_v21  ;;  %v925_v29 = vpop.f32.mrb[1].mxu1 }
 0x290   :  { %934 = vst [vmem:[#allocation8] sm:$0xff] %v1344_v24  ;;  %v1349_v30 = vadd.f32 %v925_v29, %v467_v22 }
 0x291   :  { %936 = vst [vmem:[#allocation8 + $0x10] sm:$0xff] %v1348_v27  ;;  %935 = vst [vmem:[#allocation8 + $0x8] sm:$0xff] %v1345_v28  ;;  %v698_v31 = vpop.f32.mrb[2].mxu0 }
 0x292   :  { %937 = vst [vmem:[#allocation8 + $0x18] sm:$0xff] %v1349_v30  ;;  %v1346_v32 = vadd.f32 %v698_v31, %v455_v19  ;;  %v929_v33 = vpop.f32.mrb[2].mxu1  ;;  %v700_v34 = vpop.f32.mrb[3].mxu0 }
 0x293   :  { %v1350_v35 = vadd.f32 %v929_v33, %v463_v20  ;;  %v1347_v36 = vadd.f32 %v700_v34, %v459_v21  ;;  %v931_v37 = vpop.f32.mrb[3].mxu1 }
 0x294   :  { %938 = vst [vmem:[#allocation8 + $0x20] sm:$0xff] %v1346_v32  ;;  %v1351_v38 = vadd.f32 %v931_v37, %v467_v22 }
 0x295   :  { %940 = vst [vmem:[#allocation8 + $0x30] sm:$0xff] %v1350_v35  ;;  %939 = vst [vmem:[#allocation8 + $0x28] sm:$0xff] %v1347_v36 }
 0x296   :  { %941 = vst [vmem:[#allocation8 + $0x38] sm:$0xff] %v1351_v38 }
 0x297   :  { %1453 = shalt.err (!%p1450_p0)
}
 0x298   :  { %s1454_s25 = scalar_lea.hbm %s1556_s3, 1024 }
 0x299   :  { %p1455_p1 = scmp.ne.s32.totalorder %s1556_s3, %s1454_s25  ;;  %p1458_p2 = scmp.lt.u32.totalorder %s1454_s25, %s1556_s3 }
 0x29b   :  { %p1460_p3 = pnand %p1458_p2, %p1455_p1 }
 0x29d   :  { %1463 = shalt.err (!%p1460_p3)
}
 0x29e   :  { %s1476_s30 = smov 512   ;;  %s1477_s4 = smov 32  }
 0x29f   :  { %953 = dma.vmem_to_hbm [thread:$0]  %s948_s21, 1024, %s1556_s3, [#allocation4], %s1476_s30, %s1476_s30, %s1477_s4  }
 0x2a0   :  { %1468 = dma.done.wait [#allocation4], 1024  }
 0x2a1   :  { %1469 = vsyncadd [#allocation4], 4294966272 }
 0x2a2   :  { %957 = vsyncpa [#allocation3], 1 }
 0x2a3   :  { %958 = vsyncpa [#allocation6], 1 }
 0x2a4   :  { %959 = vsyncpa [#allocation4], 1 }

</bundles_post_ra>
